<compile_context>
chip_gen: v7x
topology: tpu7x:2x2x1
jax: 0.10.0
libtpu: 0.0.40
codegen_flags: <defaults>
</compile_context>

<pallas_src>
import jax
import jax.numpy as jnp
from jax import lax
from jax.experimental import pallas as pl
from jax.experimental.pallas import tpu as pltpu


# ----------------------------------------------------------------------------- kernel
def _gru_seq_kernel(tok_ref,    # SMEM scalar-prefetch: (T,) int32 token ids
                    emb_ref,    # VMEM: (V, H)  full embedding table (resident)
                    h0_ref,     # VMEM: (1, H)  initial hidden state
                    wx_ref,     # VMEM: (H, 3H) input->gates weights, columns [r|z|n]
                    wh_ref,     # VMEM: (H, 3H) hidden->gates weights, columns [r|z|n]
                    bx_ref,     # VMEM: (1, 3H) input bias
                    bh_ref,     # VMEM: (1, 3H) hidden bias
                    out_ref,    # VMEM out: (T, H) per-step hidden states
                    x_scr,      # VMEM scratch: (T, H)  gathered embeddings
                    gi_scr):    # VMEM scratch: (T, 3H) hoisted input-side gates
    T, H = out_ref.shape

    # 1) Gather the T embedding rows from the VMEM-resident table (tiny dynamic loads).
    for i in range(T):
        x_scr[pl.ds(i, 1), :] = emb_ref[pl.ds(tok_ref[i], 1), :]

    # 2) Hoisted, batched input-side matmul: (T, H) @ (H, 3H) -> (T, 3H).
    gi_scr[...] = jnp.dot(x_scr[...], wx_ref[...],
                          preferred_element_type=jnp.float32) + bx_ref[...]

    # 3) Serial recurrence: only h @ W_h + gate math on the critical path.
    wh = wh_ref[...]
    bh = bh_ref[...]

    def step(t, h):                                      # h: (1, H)
        gi = gi_scr[pl.ds(t, 1), :]                      # (1, 3H)
        gh = jnp.dot(h, wh, preferred_element_type=jnp.float32) + bh
        r = jax.nn.sigmoid(gi[:, 0:H] + gh[:, 0:H])
        z = jax.nn.sigmoid(gi[:, H:2 * H] + gh[:, H:2 * H])
        n = jnp.tanh(gi[:, 2 * H:3 * H] + r * gh[:, 2 * H:3 * H])
        h_new = (1.0 - z) * n + z * h
        out_ref[pl.ds(t, 1), :] = h_new                  # resident block; 1 HBM DMA at end
        return h_new

    lax.fori_loop(0, T, step, h0_ref[...], unroll=True)


# ----------------------------------------------------------------------------- wrapper
def pack_gru_params(params):
    """One-time repacking of PyTorch-layout GRU params into the kernel layout."""
    emb = params["embedding"].astype(jnp.float32)        # (V, H)
    H = emb.shape[1]
    w_x = params["w_ih"].T.astype(jnp.float32)           # (H, 3H) columns [r|z|n]
    w_h = params["w_hh"].T.astype(jnp.float32)           # (H, 3H) columns [r|z|n]
    b_x = params["b_ih"].astype(jnp.float32).reshape(1, 3 * H)
    b_h = params["b_hh"].astype(jnp.float32).reshape(1, 3 * H)
    return {"emb": emb, "w_x": w_x, "w_h": w_h, "b_x": b_x, "b_h": b_h, "H": H}


@jax.jit
def encoder_rnn_sequence(tokens, hidden, emb, w_x, w_h, b_x, b_h):
    """Run the GRU over a whole token sequence in ONE pallas_call.

    tokens: (T,) int32; hidden: (1, 1, H) f32.
    Returns (outputs (T, 1, H), final hidden (1, 1, H))."""
    T = tokens.shape[0]
    V, H = emb.shape
    h0 = hidden.reshape(1, H).astype(jnp.float32)
    toks = tokens.astype(jnp.int32)

    outs = pl.pallas_call(
        _gru_seq_kernel,
        out_shape=jax.ShapeDtypeStruct((T, H), jnp.float32),
        grid_spec=pltpu.PrefetchScalarGridSpec(
            num_scalar_prefetch=1,       # token ids -> SMEM, read inside the kernel
            grid=(1,),                   # single grid step; recurrence is in-kernel
            in_specs=[
                # Everything is DMA'd once and stays VMEM-resident (constant index_maps).
                pl.BlockSpec((V, H), lambda i, tok: (0, 0)),          # embedding table
                pl.BlockSpec((1, H), lambda i, tok: (0, 0)),          # h0
                pl.BlockSpec((H, 3 * H), lambda i, tok: (0, 0)),      # W_x
                pl.BlockSpec((H, 3 * H), lambda i, tok: (0, 0)),      # W_h
                pl.BlockSpec((1, 3 * H), lambda i, tok: (0, 0)),      # b_x
                pl.BlockSpec((1, 3 * H), lambda i, tok: (0, 0)),      # b_h
            ],
            out_specs=pl.BlockSpec((T, H), lambda i, tok: (0, 0)),    # bulk writeback
            scratch_shapes=[
                pltpu.VMEM((T, H), jnp.float32),                      # gathered x
                pltpu.VMEM((T, 3 * H), jnp.float32),                  # hoisted gi
            ],
        ),
        compiler_params=pltpu.CompilerParams(
            # Serial recurrence: must stay "arbitrary"; never split across cores.
            dimension_semantics=("arbitrary",)),
    )(toks, emb, h0, w_x, w_h, b_x, b_h)

    outputs = outs.reshape(T, 1, H)
    hidden_T = outs[T - 1:T].reshape(1, 1, H)   # final hidden == last output row
    return outputs, hidden_T


def encoder_rnn_forward(token, hidden, packed):
    """Single-step interface matching EncoderRNN.forward(input, hidden).

    NOTE: for autoregressive use prefer encoder_rnn_sequence over the whole
    sequence — one pallas_call per token is dominated by dispatch overhead."""
    toks = jnp.asarray(token, jnp.int32).reshape(1)
    outs, h_new = encoder_rnn_sequence(toks, hidden, packed["emb"], packed["w_x"],
                                       packed["w_h"], packed["b_x"], packed["b_h"])
    H = packed["H"]
    return outs.reshape(1, 1, H), h_new


# ----------------------------------------------------------------------------- init / reference
def init_params(input_size, hidden_size, key):
    """Deterministic init matching the PyTorch module's parameter shapes."""
    k_emb, k_wih, k_whh, k_bih, k_bhh = jax.random.split(key, 5)
    bound = 1.0 / jnp.sqrt(hidden_size)
    return {
        # nn.Embedding(input_size, hidden_size): N(0, 1)
        "embedding": jax.random.normal(k_emb, (input_size, hidden_size), jnp.float32),
        # nn.GRU(hidden_size, hidden_size): U(-1/sqrt(H), 1/sqrt(H))
        "w_ih": jax.random.uniform(k_wih, (3 * hidden_size, hidden_size),
                                   jnp.float32, -bound, bound),
        "w_hh": jax.random.uniform(k_whh, (3 * hidden_size, hidden_size),
                                   jnp.float32, -bound, bound),
        "b_ih": jax.random.uniform(k_bih, (3 * hidden_size,),
                                   jnp.float32, -bound, bound),
        "b_hh": jax.random.uniform(k_bhh, (3 * hidden_size,),
                                   jnp.float32, -bound, bound),
    }


def _reference_step(token, h, params):
    """Pure-JAX single GRU step with the original (unpacked) PyTorch params."""
    H = params["embedding"].shape[1]
    x = params["embedding"][token].reshape(1, H)
    gi = x @ params["w_ih"].T + params["b_ih"]
    gh = h @ params["w_hh"].T + params["b_hh"]
    i_r, i_z, i_n = gi[:, :H], gi[:, H:2 * H], gi[:, 2 * H:]
    h_r, h_z, h_n = gh[:, :H], gh[:, H:2 * H], gh[:, 2 * H:]
    r = jax.nn.sigmoid(i_r + h_r)
    z = jax.nn.sigmoid(i_z + h_z)
    n = jnp.tanh(i_n + r * h_n)
    return (1.0 - z) * n + z * h


def _reference_sequence(tokens, hidden, params):
    H = params["embedding"].shape[1]
    h = hidden.reshape(1, H)
    outs = []
    for t in range(tokens.shape[0]):
        h = _reference_step(int(tokens[t]), h, params)
        outs.append(h)
    return jnp.stack(outs).reshape(-1, 1, H), h.reshape(1, 1, H)


# ----------------------------------------------------------------------------- main
if __name__ == "__main__":
    INPUT_SIZE = 16      # vocab size
    HIDDEN_SIZE = 32
    SEQ_LEN = 8

    key = jax.random.PRNGKey(0)
    params = init_params(INPUT_SIZE, HIDDEN_SIZE, key)
    packed = pack_gru_params(params)

    tokens = jax.random.randint(jax.random.PRNGKey(1), (SEQ_LEN,), 0, INPUT_SIZE,
                                dtype=jnp.int32)
    hidden0 = jnp.zeros((1, 1, HIDDEN_SIZE), jnp.float32)   # initHidden()

    # --- whole-sequence kernel (one pallas_call, single grid step) ---
    outputs, hidden_T = encoder_rnn_sequence(
        tokens, hidden0, packed["emb"], packed["w_x"], packed["w_h"],
        packed["b_x"], packed["b_h"])
    outputs = jax.block_until_ready(outputs)
    hidden_T = jax.block_until_ready(hidden_T)

    ref_outs, ref_hT = _reference_sequence(tokens, hidden0, params)
    assert outputs.shape == (SEQ_LEN, 1, HIDDEN_SIZE)
    assert hidden_T.shape == (1, 1, HIDDEN_SIZE)
    assert jnp.allclose(outputs, ref_outs, atol=1e-5, rtol=1e-5)
    assert jnp.allclose(hidden_T, ref_hT, atol=1e-5, rtol=1e-5)

    # --- single-step interface (matches EncoderRNN.forward exactly) ---
    token = jnp.int32(5)
    out1, h1 = encoder_rnn_forward(token, hidden0, packed)
    out1 = jax.block_until_ready(out1)
    h1 = jax.block_until_ready(h1)
    ref_h1 = _reference_step(int(token), hidden0.reshape(1, HIDDEN_SIZE), params)
    assert out1.shape == (1, 1, HIDDEN_SIZE) and h1.shape == (1, 1, HIDDEN_SIZE)
    assert jnp.allclose(out1, ref_h1.reshape(1, 1, HIDDEN_SIZE), atol=1e-5, rtol=1e-5)
    assert jnp.allclose(h1, ref_h1.reshape(1, 1, HIDDEN_SIZE), atol=1e-5, rtol=1e-5)

    print("KERNEL_OK")
</pallas_src>

<mosaic_0001>
module attributes {stable_mosaic.version = 11 : i64} {
  func.func @_gru_seq_kernel(%arg0: i32, %arg1: memref<8xi32, #tpu.memory_space<smem>>, %arg2: memref<16x32xf32, #tpu.memory_space<vmem>>, %arg3: memref<1x32xf32, #tpu.memory_space<vmem>>, %arg4: memref<32x96xf32, #tpu.memory_space<vmem>>, %arg5: memref<32x96xf32, #tpu.memory_space<vmem>>, %arg6: memref<1x96xf32, #tpu.memory_space<vmem>>, %arg7: memref<1x96xf32, #tpu.memory_space<vmem>>, %arg8: memref<8x32xf32, #tpu.memory_space<vmem>>, %arg9: memref<8x32xf32, #tpu.memory_space<vmem>>, %arg10: memref<8x96xf32, #tpu.memory_space<vmem>>) attributes {dimension_semantics = [#tpu.dimension_semantics<arbitrary>], iteration_bounds = array<i64: 1>, scalar_prefetch = 1 : i64, scratch_operands = 2 : i64, tpu.core_type = #tpu.core_type<tc>, window_params = [{pipeline_mode = #tpu.pipeline_mode<synchronous>, transform_indices = @transform_0, window_bounds = array<i64: 16, 32>}, {pipeline_mode = #tpu.pipeline_mode<synchronous>, transform_indices = @transform_1, window_bounds = array<i64: 1, 32>}, {pipeline_mode = #tpu.pipeline_mode<synchronous>, transform_indices = @transform_2, window_bounds = array<i64: 32, 96>}, {pipeline_mode = #tpu.pipeline_mode<synchronous>, transform_indices = @transform_3, window_bounds = array<i64: 32, 96>}, {pipeline_mode = #tpu.pipeline_mode<synchronous>, transform_indices = @transform_4, window_bounds = array<i64: 1, 96>}, {pipeline_mode = #tpu.pipeline_mode<synchronous>, transform_indices = @transform_5, window_bounds = array<i64: 1, 96>}, {pipeline_mode = #tpu.pipeline_mode<synchronous>, transform_indices = @transform_6, window_bounds = array<i64: 8, 32>}]} {
    %c0 = arith.constant 0 : index
    %0 = memref.load %arg1[%c0] : memref<8xi32, #tpu.memory_space<smem>>
    %1 = arith.index_cast %0 : i32 to index
    %c0_0 = arith.constant 0 : index
    %2 = vector.load %arg2[%1, %c0_0] : memref<16x32xf32, #tpu.memory_space<vmem>>, vector<1x32xf32>
    %c0_1 = arith.constant 0 : index
    %c0_2 = arith.constant 0 : index
    %3 = vector.load %arg9[%c0_1, %c0_2] : memref<8x32xf32, #tpu.memory_space<vmem>>, vector<1x32xf32>
    tpu.vector_store %arg9[%c0_1, %c0_2], %2 {strides = array<i32>} : memref<8x32xf32, #tpu.memory_space<vmem>>, vector<1x32xf32>,
    %c1 = arith.constant 1 : index
    %4 = memref.load %arg1[%c1] : memref<8xi32, #tpu.memory_space<smem>>
    %5 = arith.index_cast %4 : i32 to index
    %c0_3 = arith.constant 0 : index
    %6 = vector.load %arg2[%5, %c0_3] : memref<16x32xf32, #tpu.memory_space<vmem>>, vector<1x32xf32>
    %c1_4 = arith.constant 1 : index
    %c0_5 = arith.constant 0 : index
    %7 = vector.load %arg9[%c1_4, %c0_5] : memref<8x32xf32, #tpu.memory_space<vmem>>, vector<1x32xf32>
    tpu.vector_store %arg9[%c1_4, %c0_5], %6 {strides = array<i32>} : memref<8x32xf32, #tpu.memory_space<vmem>>, vector<1x32xf32>,
    %c2 = arith.constant 2 : index
    %8 = memref.load %arg1[%c2] : memref<8xi32, #tpu.memory_space<smem>>
    %9 = arith.index_cast %8 : i32 to index
    %c0_6 = arith.constant 0 : index
    %10 = vector.load %arg2[%9, %c0_6] : memref<16x32xf32, #tpu.memory_space<vmem>>, vector<1x32xf32>
    %c2_7 = arith.constant 2 : index
    %c0_8 = arith.constant 0 : index
    %11 = vector.load %arg9[%c2_7, %c0_8] : memref<8x32xf32, #tpu.memory_space<vmem>>, vector<1x32xf32>
    tpu.vector_store %arg9[%c2_7, %c0_8], %10 {strides = array<i32>} : memref<8x32xf32, #tpu.memory_space<vmem>>, vector<1x32xf32>,
    %c3 = arith.constant 3 : index
    %12 = memref.load %arg1[%c3] : memref<8xi32, #tpu.memory_space<smem>>
    %13 = arith.index_cast %12 : i32 to index
    %c0_9 = arith.constant 0 : index
    %14 = vector.load %arg2[%13, %c0_9] : memref<16x32xf32, #tpu.memory_space<vmem>>, vector<1x32xf32>
    %c3_10 = arith.constant 3 : index
    %c0_11 = arith.constant 0 : index
    %15 = vector.load %arg9[%c3_10, %c0_11] : memref<8x32xf32, #tpu.memory_space<vmem>>, vector<1x32xf32>
    tpu.vector_store %arg9[%c3_10, %c0_11], %14 {strides = array<i32>} : memref<8x32xf32, #tpu.memory_space<vmem>>, vector<1x32xf32>,
    %c4 = arith.constant 4 : index
    %16 = memref.load %arg1[%c4] : memref<8xi32, #tpu.memory_space<smem>>
    %17 = arith.index_cast %16 : i32 to index
    %c0_12 = arith.constant 0 : index
    %18 = vector.load %arg2[%17, %c0_12] : memref<16x32xf32, #tpu.memory_space<vmem>>, vector<1x32xf32>
    %c4_13 = arith.constant 4 : index
    %c0_14 = arith.constant 0 : index
    %19 = vector.load %arg9[%c4_13, %c0_14] : memref<8x32xf32, #tpu.memory_space<vmem>>, vector<1x32xf32>
    tpu.vector_store %arg9[%c4_13, %c0_14], %18 {strides = array<i32>} : memref<8x32xf32, #tpu.memory_space<vmem>>, vector<1x32xf32>,
    %c5 = arith.constant 5 : index
    %20 = memref.load %arg1[%c5] : memref<8xi32, #tpu.memory_space<smem>>
    %21 = arith.index_cast %20 : i32 to index
    %c0_15 = arith.constant 0 : index
    %22 = vector.load %arg2[%21, %c0_15] : memref<16x32xf32, #tpu.memory_space<vmem>>, vector<1x32xf32>
    %c5_16 = arith.constant 5 : index
    %c0_17 = arith.constant 0 : index
    %23 = vector.load %arg9[%c5_16, %c0_17] : memref<8x32xf32, #tpu.memory_space<vmem>>, vector<1x32xf32>
    tpu.vector_store %arg9[%c5_16, %c0_17], %22 {strides = array<i32>} : memref<8x32xf32, #tpu.memory_space<vmem>>, vector<1x32xf32>,
    %c6 = arith.constant 6 : index
    %24 = memref.load %arg1[%c6] : memref<8xi32, #tpu.memory_space<smem>>
    %25 = arith.index_cast %24 : i32 to index
    %c0_18 = arith.constant 0 : index
    %26 = vector.load %arg2[%25, %c0_18] : memref<16x32xf32, #tpu.memory_space<vmem>>, vector<1x32xf32>
    %c6_19 = arith.constant 6 : index
    %c0_20 = arith.constant 0 : index
    %27 = vector.load %arg9[%c6_19, %c0_20] : memref<8x32xf32, #tpu.memory_space<vmem>>, vector<1x32xf32>
    tpu.vector_store %arg9[%c6_19, %c0_20], %26 {strides = array<i32>} : memref<8x32xf32, #tpu.memory_space<vmem>>, vector<1x32xf32>,
    %c7 = arith.constant 7 : index
    %28 = memref.load %arg1[%c7] : memref<8xi32, #tpu.memory_space<smem>>
    %29 = arith.index_cast %28 : i32 to index
    %c0_21 = arith.constant 0 : index
    %30 = vector.load %arg2[%29, %c0_21] : memref<16x32xf32, #tpu.memory_space<vmem>>, vector<1x32xf32>
    %c7_22 = arith.constant 7 : index
    %c0_23 = arith.constant 0 : index
    %31 = vector.load %arg9[%c7_22, %c0_23] : memref<8x32xf32, #tpu.memory_space<vmem>>, vector<1x32xf32>
    tpu.vector_store %arg9[%c7_22, %c0_23], %30 {strides = array<i32>} : memref<8x32xf32, #tpu.memory_space<vmem>>, vector<1x32xf32>,
    %c0_24 = arith.constant 0 : index
    %c0_25 = arith.constant 0 : index
    %32 = vector.load %arg9[%c0_24, %c0_25] : memref<8x32xf32, #tpu.memory_space<vmem>>, vector<8x32xf32>
    %c0_26 = arith.constant 0 : index
    %c0_27 = arith.constant 0 : index
    %33 = vector.load %arg4[%c0_26, %c0_27] : memref<32x96xf32, #tpu.memory_space<vmem>>, vector<32x96xf32>
    %cst = arith.constant dense<0.000000e+00> : vector<8x96xf32>
    %34 = tpu.matmul %32, %33, %cst {dimension_numbers = #tpu.dot_dimension_numbers<[1], [0], [0], [1], [0, 0, 1, 1], [], []>} : vector<8x32xf32>, vector<32x96xf32>, vector<8x96xf32> -> vector<8x96xf32>
    %c0_28 = arith.constant 0 : index
    %c0_29 = arith.constant 0 : index
    %35 = vector.load %arg6[%c0_28, %c0_29] : memref<1x96xf32, #tpu.memory_space<vmem>>, vector<1x96xf32>
    %36 = vector.broadcast %35 : vector<1x96xf32> to vector<8x96xf32>
    %37 = arith.addf %34, %36 : vector<8x96xf32>
    %c0_30 = arith.constant 0 : index
    %c0_31 = arith.constant 0 : index
    %38 = vector.load %arg10[%c0_30, %c0_31] : memref<8x96xf32, #tpu.memory_space<vmem>>, vector<8x96xf32>
    tpu.vector_store %arg10[%c0_30, %c0_31], %37 {strides = array<i32>} : memref<8x96xf32, #tpu.memory_space<vmem>>, vector<8x96xf32>,
    %c0_32 = arith.constant 0 : index
    %c0_33 = arith.constant 0 : index
    %39 = vector.load %arg5[%c0_32, %c0_33] : memref<32x96xf32, #tpu.memory_space<vmem>>, vector<32x96xf32>
    %c0_34 = arith.constant 0 : index
    %c0_35 = arith.constant 0 : index
    %40 = vector.load %arg7[%c0_34, %c0_35] : memref<1x96xf32, #tpu.memory_space<vmem>>, vector<1x96xf32>
    %c0_36 = arith.constant 0 : index
    %c0_37 = arith.constant 0 : index
    %41 = vector.load %arg3[%c0_36, %c0_37] : memref<1x32xf32, #tpu.memory_space<vmem>>, vector<1x32xf32>
    %c0_i32 = arith.constant 0 : i32
    %42 = arith.index_cast %c0_i32 : i32 to index
    %c0_38 = arith.constant 0 : index
    %43 = vector.load %arg10[%42, %c0_38] : memref<8x96xf32, #tpu.memory_space<vmem>>, vector<1x96xf32>
    %cst_39 = arith.constant dense<0.000000e+00> : vector<1x96xf32>
    %44 = tpu.matmul %41, %39, %cst_39 {dimension_numbers = #tpu.dot_dimension_numbers<[1], [0], [0], [1], [0, 0, 1, 1], [], []>} : vector<1x32xf32>, vector<32x96xf32>, vector<1x96xf32> -> vector<1x96xf32>
    %45 = arith.addf %44, %40 : vector<1x96xf32>
    %46 = vector.extract_strided_slice %43 {offsets = [0, 0], sizes = [1, 32], strides = [1, 1]} : vector<1x96xf32> to vector<1x32xf32>
    %47 = vector.extract_strided_slice %45 {offsets = [0, 0], sizes = [1, 32], strides = [1, 1]} : vector<1x96xf32> to vector<1x32xf32>
    %48 = arith.addf %46, %47 : vector<1x32xf32>
    %49 = arith.negf %48 : vector<1x32xf32>
    %50 = math.exp %49 : vector<1x32xf32>
    %cst_40 = arith.constant 1.000000e+00 : f32
    %51 = vector.broadcast %cst_40 : f32 to vector<1x32xf32>
    %52 = arith.addf %51, %50 : vector<1x32xf32>
    %53 = arith.divf %51, %52 : vector<1x32xf32>
    %54 = vector.extract_strided_slice %43 {offsets = [0, 32], sizes = [1, 32], strides = [1, 1]} : vector<1x96xf32> to vector<1x32xf32>
    %55 = vector.extract_strided_slice %45 {offsets = [0, 32], sizes = [1, 32], strides = [1, 1]} : vector<1x96xf32> to vector<1x32xf32>
    %56 = arith.addf %54, %55 : vector<1x32xf32>
    %57 = arith.negf %56 : vector<1x32xf32>
    %58 = math.exp %57 : vector<1x32xf32>
    %cst_41 = arith.constant 1.000000e+00 : f32
    %59 = vector.broadcast %cst_41 : f32 to vector<1x32xf32>
    %60 = arith.addf %59, %58 : vector<1x32xf32>
    %61 = arith.divf %59, %60 : vector<1x32xf32>
    %62 = vector.extract_strided_slice %43 {offsets = [0, 64], sizes = [1, 32], strides = [1, 1]} : vector<1x96xf32> to vector<1x32xf32>
    %63 = vector.extract_strided_slice %45 {offsets = [0, 64], sizes = [1, 32], strides = [1, 1]} : vector<1x96xf32> to vector<1x32xf32>
    %64 = arith.mulf %53, %63 : vector<1x32xf32>
    %65 = arith.addf %62, %64 : vector<1x32xf32>
    %66 = math.tanh %65 : vector<1x32xf32>
    %cst_42 = arith.constant 1.000000e+00 : f32
    %67 = vector.broadcast %cst_42 : f32 to vector<1x32xf32>
    %68 = arith.subf %67, %61 : vector<1x32xf32>
    %69 = arith.mulf %68, %66 : vector<1x32xf32>
    %70 = arith.mulf %61, %41 : vector<1x32xf32>
    %71 = arith.addf %69, %70 : vector<1x32xf32>
    %72 = arith.index_cast %c0_i32 : i32 to index
    %c0_43 = arith.constant 0 : index
    %73 = vector.load %arg8[%72, %c0_43] : memref<8x32xf32, #tpu.memory_space<vmem>>, vector<1x32xf32>
    tpu.vector_store %arg8[%72, %c0_43], %71 {strides = array<i32>} : memref<8x32xf32, #tpu.memory_space<vmem>>, vector<1x32xf32>,
    %c1_i32 = arith.constant 1 : i32
    %74 = arith.index_cast %c1_i32 : i32 to index
    %c0_44 = arith.constant 0 : index
    %75 = vector.load %arg10[%74, %c0_44] : memref<8x96xf32, #tpu.memory_space<vmem>>, vector<1x96xf32>
    %cst_45 = arith.constant dense<0.000000e+00> : vector<1x96xf32>
    %76 = tpu.matmul %71, %39, %cst_45 {dimension_numbers = #tpu.dot_dimension_numbers<[1], [0], [0], [1], [0, 0, 1, 1], [], []>} : vector<1x32xf32>, vector<32x96xf32>, vector<1x96xf32> -> vector<1x96xf32>
    %77 = arith.addf %76, %40 : vector<1x96xf32>
    %78 = vector.extract_strided_slice %75 {offsets = [0, 0], sizes = [1, 32], strides = [1, 1]} : vector<1x96xf32> to vector<1x32xf32>
    %79 = vector.extract_strided_slice %77 {offsets = [0, 0], sizes = [1, 32], strides = [1, 1]} : vector<1x96xf32> to vector<1x32xf32>
    %80 = arith.addf %78, %79 : vector<1x32xf32>
    %81 = arith.negf %80 : vector<1x32xf32>
    %82 = math.exp %81 : vector<1x32xf32>
    %cst_46 = arith.constant 1.000000e+00 : f32
    %83 = vector.broadcast %cst_46 : f32 to vector<1x32xf32>
    %84 = arith.addf %83, %82 : vector<1x32xf32>
    %85 = arith.divf %83, %84 : vector<1x32xf32>
    %86 = vector.extract_strided_slice %75 {offsets = [0, 32], sizes = [1, 32], strides = [1, 1]} : vector<1x96xf32> to vector<1x32xf32>
    %87 = vector.extract_strided_slice %77 {offsets = [0, 32], sizes = [1, 32], strides = [1, 1]} : vector<1x96xf32> to vector<1x32xf32>
    %88 = arith.addf %86, %87 : vector<1x32xf32>
    %89 = arith.negf %88 : vector<1x32xf32>
    %90 = math.exp %89 : vector<1x32xf32>
    %cst_47 = arith.constant 1.000000e+00 : f32
    %91 = vector.broadcast %cst_47 : f32 to vector<1x32xf32>
    %92 = arith.addf %91, %90 : vector<1x32xf32>
    %93 = arith.divf %91, %92 : vector<1x32xf32>
    %94 = vector.extract_strided_slice %75 {offsets = [0, 64], sizes = [1, 32], strides = [1, 1]} : vector<1x96xf32> to vector<1x32xf32>
    %95 = vector.extract_strided_slice %77 {offsets = [0, 64], sizes = [1, 32], strides = [1, 1]} : vector<1x96xf32> to vector<1x32xf32>
    %96 = arith.mulf %85, %95 : vector<1x32xf32>
    %97 = arith.addf %94, %96 : vector<1x32xf32>
    %98 = math.tanh %97 : vector<1x32xf32>
    %cst_48 = arith.constant 1.000000e+00 : f32
    %99 = vector.broadcast %cst_48 : f32 to vector<1x32xf32>
    %100 = arith.subf %99, %93 : vector<1x32xf32>
    %101 = arith.mulf %100, %98 : vector<1x32xf32>
    %102 = arith.mulf %93, %71 : vector<1x32xf32>
    %103 = arith.addf %101, %102 : vector<1x32xf32>
    %104 = arith.index_cast %c1_i32 : i32 to index
    %c0_49 = arith.constant 0 : index
    %105 = vector.load %arg8[%104, %c0_49] : memref<8x32xf32, #tpu.memory_space<vmem>>, vector<1x32xf32>
    tpu.vector_store %arg8[%104, %c0_49], %103 {strides = array<i32>} : memref<8x32xf32, #tpu.memory_space<vmem>>, vector<1x32xf32>,
    %c2_i32 = arith.constant 2 : i32
    %106 = arith.index_cast %c2_i32 : i32 to index
    %c0_50 = arith.constant 0 : index
    %107 = vector.load %arg10[%106, %c0_50] : memref<8x96xf32, #tpu.memory_space<vmem>>, vector<1x96xf32>
    %cst_51 = arith.constant dense<0.000000e+00> : vector<1x96xf32>
    %108 = tpu.matmul %103, %39, %cst_51 {dimension_numbers = #tpu.dot_dimension_numbers<[1], [0], [0], [1], [0, 0, 1, 1], [], []>} : vector<1x32xf32>, vector<32x96xf32>, vector<1x96xf32> -> vector<1x96xf32>
    %109 = arith.addf %108, %40 : vector<1x96xf32>
    %110 = vector.extract_strided_slice %107 {offsets = [0, 0], sizes = [1, 32], strides = [1, 1]} : vector<1x96xf32> to vector<1x32xf32>
    %111 = vector.extract_strided_slice %109 {offsets = [0, 0], sizes = [1, 32], strides = [1, 1]} : vector<1x96xf32> to vector<1x32xf32>
    %112 = arith.addf %110, %111 : vector<1x32xf32>
    %113 = arith.negf %112 : vector<1x32xf32>
    %114 = math.exp %113 : vector<1x32xf32>
    %cst_52 = arith.constant 1.000000e+00 : f32
    %115 = vector.broadcast %cst_52 : f32 to vector<1x32xf32>
    %116 = arith.addf %115, %114 : vector<1x32xf32>
    %117 = arith.divf %115, %116 : vector<1x32xf32>
    %118 = vector.extract_strided_slice %107 {offsets = [0, 32], sizes = [1, 32], strides = [1, 1]} : vector<1x96xf32> to vector<1x32xf32>
    %119 = vector.extract_strided_slice %109 {offsets = [0, 32], sizes = [1, 32], strides = [1, 1]} : vector<1x96xf32> to vector<1x32xf32>
    %120 = arith.addf %118, %119 : vector<1x32xf32>
    %121 = arith.negf %120 : vector<1x32xf32>
    %122 = math.exp %121 : vector<1x32xf32>
    %cst_53 = arith.constant 1.000000e+00 : f32
    %123 = vector.broadcast %cst_53 : f32 to vector<1x32xf32>
    %124 = arith.addf %123, %122 : vector<1x32xf32>
    %125 = arith.divf %123, %124 : vector<1x32xf32>
    %126 = vector.extract_strided_slice %107 {offsets = [0, 64], sizes = [1, 32], strides = [1, 1]} : vector<1x96xf32> to vector<1x32xf32>
    %127 = vector.extract_strided_slice %109 {offsets = [0, 64], sizes = [1, 32], strides = [1, 1]} : vector<1x96xf32> to vector<1x32xf32>
    %128 = arith.mulf %117, %127 : vector<1x32xf32>
    %129 = arith.addf %126, %128 : vector<1x32xf32>
    %130 = math.tanh %129 : vector<1x32xf32>
    %cst_54 = arith.constant 1.000000e+00 : f32
    %131 = vector.broadcast %cst_54 : f32 to vector<1x32xf32>
    %132 = arith.subf %131, %125 : vector<1x32xf32>
    %133 = arith.mulf %132, %130 : vector<1x32xf32>
    %134 = arith.mulf %125, %103 : vector<1x32xf32>
    %135 = arith.addf %133, %134 : vector<1x32xf32>
    %136 = arith.index_cast %c2_i32 : i32 to index
    %c0_55 = arith.constant 0 : index
    %137 = vector.load %arg8[%136, %c0_55] : memref<8x32xf32, #tpu.memory_space<vmem>>, vector<1x32xf32>
    tpu.vector_store %arg8[%136, %c0_55], %135 {strides = array<i32>} : memref<8x32xf32, #tpu.memory_space<vmem>>, vector<1x32xf32>,
    %c3_i32 = arith.constant 3 : i32
    %138 = arith.index_cast %c3_i32 : i32 to index
    %c0_56 = arith.constant 0 : index
    %139 = vector.load %arg10[%138, %c0_56] : memref<8x96xf32, #tpu.memory_space<vmem>>, vector<1x96xf32>
    %cst_57 = arith.constant dense<0.000000e+00> : vector<1x96xf32>
    %140 = tpu.matmul %135, %39, %cst_57 {dimension_numbers = #tpu.dot_dimension_numbers<[1], [0], [0], [1], [0, 0, 1, 1], [], []>} : vector<1x32xf32>, vector<32x96xf32>, vector<1x96xf32> -> vector<1x96xf32>
    %141 = arith.addf %140, %40 : vector<1x96xf32>
    %142 = vector.extract_strided_slice %139 {offsets = [0, 0], sizes = [1, 32], strides = [1, 1]} : vector<1x96xf32> to vector<1x32xf32>
    %143 = vector.extract_strided_slice %141 {offsets = [0, 0], sizes = [1, 32], strides = [1, 1]} : vector<1x96xf32> to vector<1x32xf32>
    %144 = arith.addf %142, %143 : vector<1x32xf32>
    %145 = arith.negf %144 : vector<1x32xf32>
    %146 = math.exp %145 : vector<1x32xf32>
    %cst_58 = arith.constant 1.000000e+00 : f32
    %147 = vector.broadcast %cst_58 : f32 to vector<1x32xf32>
    %148 = arith.addf %147, %146 : vector<1x32xf32>
    %149 = arith.divf %147, %148 : vector<1x32xf32>
    %150 = vector.extract_strided_slice %139 {offsets = [0, 32], sizes = [1, 32], strides = [1, 1]} : vector<1x96xf32> to vector<1x32xf32>
    %151 = vector.extract_strided_slice %141 {offsets = [0, 32], sizes = [1, 32], strides = [1, 1]} : vector<1x96xf32> to vector<1x32xf32>
    %152 = arith.addf %150, %151 : vector<1x32xf32>
    %153 = arith.negf %152 : vector<1x32xf32>
    %154 = math.exp %153 : vector<1x32xf32>
    %cst_59 = arith.constant 1.000000e+00 : f32
    %155 = vector.broadcast %cst_59 : f32 to vector<1x32xf32>
    %156 = arith.addf %155, %154 : vector<1x32xf32>
    %157 = arith.divf %155, %156 : vector<1x32xf32>
    %158 = vector.extract_strided_slice %139 {offsets = [0, 64], sizes = [1, 32], strides = [1, 1]} : vector<1x96xf32> to vector<1x32xf32>
    %159 = vector.extract_strided_slice %141 {offsets = [0, 64], sizes = [1, 32], strides = [1, 1]} : vector<1x96xf32> to vector<1x32xf32>
    %160 = arith.mulf %149, %159 : vector<1x32xf32>
    %161 = arith.addf %158, %160 : vector<1x32xf32>
    %162 = math.tanh %161 : vector<1x32xf32>
    %cst_60 = arith.constant 1.000000e+00 : f32
    %163 = vector.broadcast %cst_60 : f32 to vector<1x32xf32>
    %164 = arith.subf %163, %157 : vector<1x32xf32>
    %165 = arith.mulf %164, %162 : vector<1x32xf32>
    %166 = arith.mulf %157, %135 : vector<1x32xf32>
    %167 = arith.addf %165, %166 : vector<1x32xf32>
    %168 = arith.index_cast %c3_i32 : i32 to index
    %c0_61 = arith.constant 0 : index
    %169 = vector.load %arg8[%168, %c0_61] : memref<8x32xf32, #tpu.memory_space<vmem>>, vector<1x32xf32>
    tpu.vector_store %arg8[%168, %c0_61], %167 {strides = array<i32>} : memref<8x32xf32, #tpu.memory_space<vmem>>, vector<1x32xf32>,
    %c4_i32 = arith.constant 4 : i32
    %170 = arith.index_cast %c4_i32 : i32 to index
    %c0_62 = arith.constant 0 : index
    %171 = vector.load %arg10[%170, %c0_62] : memref<8x96xf32, #tpu.memory_space<vmem>>, vector<1x96xf32>
    %cst_63 = arith.constant dense<0.000000e+00> : vector<1x96xf32>
    %172 = tpu.matmul %167, %39, %cst_63 {dimension_numbers = #tpu.dot_dimension_numbers<[1], [0], [0], [1], [0, 0, 1, 1], [], []>} : vector<1x32xf32>, vector<32x96xf32>, vector<1x96xf32> -> vector<1x96xf32>
    %173 = arith.addf %172, %40 : vector<1x96xf32>
    %174 = vector.extract_strided_slice %171 {offsets = [0, 0], sizes = [1, 32], strides = [1, 1]} : vector<1x96xf32> to vector<1x32xf32>
    %175 = vector.extract_strided_slice %173 {offsets = [0, 0], sizes = [1, 32], strides = [1, 1]} : vector<1x96xf32> to vector<1x32xf32>
    %176 = arith.addf %174, %175 : vector<1x32xf32>
    %177 = arith.negf %176 : vector<1x32xf32>
    %178 = math.exp %177 : vector<1x32xf32>
    %cst_64 = arith.constant 1.000000e+00 : f32
    %179 = vector.broadcast %cst_64 : f32 to vector<1x32xf32>
    %180 = arith.addf %179, %178 : vector<1x32xf32>
    %181 = arith.divf %179, %180 : vector<1x32xf32>
    %182 = vector.extract_strided_slice %171 {offsets = [0, 32], sizes = [1, 32], strides = [1, 1]} : vector<1x96xf32> to vector<1x32xf32>
    %183 = vector.extract_strided_slice %173 {offsets = [0, 32], sizes = [1, 32], strides = [1, 1]} : vector<1x96xf32> to vector<1x32xf32>
    %184 = arith.addf %182, %183 : vector<1x32xf32>
    %185 = arith.negf %184 : vector<1x32xf32>
    %186 = math.exp %185 : vector<1x32xf32>
    %cst_65 = arith.constant 1.000000e+00 : f32
    %187 = vector.broadcast %cst_65 : f32 to vector<1x32xf32>
    %188 = arith.addf %187, %186 : vector<1x32xf32>
    %189 = arith.divf %187, %188 : vector<1x32xf32>
    %190 = vector.extract_strided_slice %171 {offsets = [0, 64], sizes = [1, 32], strides = [1, 1]} : vector<1x96xf32> to vector<1x32xf32>
    %191 = vector.extract_strided_slice %173 {offsets = [0, 64], sizes = [1, 32], strides = [1, 1]} : vector<1x96xf32> to vector<1x32xf32>
    %192 = arith.mulf %181, %191 : vector<1x32xf32>
    %193 = arith.addf %190, %192 : vector<1x32xf32>
    %194 = math.tanh %193 : vector<1x32xf32>
    %cst_66 = arith.constant 1.000000e+00 : f32
    %195 = vector.broadcast %cst_66 : f32 to vector<1x32xf32>
    %196 = arith.subf %195, %189 : vector<1x32xf32>
    %197 = arith.mulf %196, %194 : vector<1x32xf32>
    %198 = arith.mulf %189, %167 : vector<1x32xf32>
    %199 = arith.addf %197, %198 : vector<1x32xf32>
    %200 = arith.index_cast %c4_i32 : i32 to index
    %c0_67 = arith.constant 0 : index
    %201 = vector.load %arg8[%200, %c0_67] : memref<8x32xf32, #tpu.memory_space<vmem>>, vector<1x32xf32>
    tpu.vector_store %arg8[%200, %c0_67], %199 {strides = array<i32>} : memref<8x32xf32, #tpu.memory_space<vmem>>, vector<1x32xf32>,
    %c5_i32 = arith.constant 5 : i32
    %202 = arith.index_cast %c5_i32 : i32 to index
    %c0_68 = arith.constant 0 : index
    %203 = vector.load %arg10[%202, %c0_68] : memref<8x96xf32, #tpu.memory_space<vmem>>, vector<1x96xf32>
    %cst_69 = arith.constant dense<0.000000e+00> : vector<1x96xf32>
    %204 = tpu.matmul %199, %39, %cst_69 {dimension_numbers = #tpu.dot_dimension_numbers<[1], [0], [0], [1], [0, 0, 1, 1], [], []>} : vector<1x32xf32>, vector<32x96xf32>, vector<1x96xf32> -> vector<1x96xf32>
    %205 = arith.addf %204, %40 : vector<1x96xf32>
    %206 = vector.extract_strided_slice %203 {offsets = [0, 0], sizes = [1, 32], strides = [1, 1]} : vector<1x96xf32> to vector<1x32xf32>
    %207 = vector.extract_strided_slice %205 {offsets = [0, 0], sizes = [1, 32], strides = [1, 1]} : vector<1x96xf32> to vector<1x32xf32>
    %208 = arith.addf %206, %207 : vector<1x32xf32>
    %209 = arith.negf %208 : vector<1x32xf32>
    %210 = math.exp %209 : vector<1x32xf32>
    %cst_70 = arith.constant 1.000000e+00 : f32
    %211 = vector.broadcast %cst_70 : f32 to vector<1x32xf32>
    %212 = arith.addf %211, %210 : vector<1x32xf32>
    %213 = arith.divf %211, %212 : vector<1x32xf32>
    %214 = vector.extract_strided_slice %203 {offsets = [0, 32], sizes = [1, 32], strides = [1, 1]} : vector<1x96xf32> to vector<1x32xf32>
    %215 = vector.extract_strided_slice %205 {offsets = [0, 32], sizes = [1, 32], strides = [1, 1]} : vector<1x96xf32> to vector<1x32xf32>
    %216 = arith.addf %214, %215 : vector<1x32xf32>
    %217 = arith.negf %216 : vector<1x32xf32>
    %218 = math.exp %217 : vector<1x32xf32>
    %cst_71 = arith.constant 1.000000e+00 : f32
    %219 = vector.broadcast %cst_71 : f32 to vector<1x32xf32>
    %220 = arith.addf %219, %218 : vector<1x32xf32>
    %221 = arith.divf %219, %220 : vector<1x32xf32>
    %222 = vector.extract_strided_slice %203 {offsets = [0, 64], sizes = [1, 32], strides = [1, 1]} : vector<1x96xf32> to vector<1x32xf32>
    %223 = vector.extract_strided_slice %205 {offsets = [0, 64], sizes = [1, 32], strides = [1, 1]} : vector<1x96xf32> to vector<1x32xf32>
    %224 = arith.mulf %213, %223 : vector<1x32xf32>
    %225 = arith.addf %222, %224 : vector<1x32xf32>
    %226 = math.tanh %225 : vector<1x32xf32>
    %cst_72 = arith.constant 1.000000e+00 : f32
    %227 = vector.broadcast %cst_72 : f32 to vector<1x32xf32>
    %228 = arith.subf %227, %221 : vector<1x32xf32>
    %229 = arith.mulf %228, %226 : vector<1x32xf32>
    %230 = arith.mulf %221, %199 : vector<1x32xf32>
    %231 = arith.addf %229, %230 : vector<1x32xf32>
    %232 = arith.index_cast %c5_i32 : i32 to index
    %c0_73 = arith.constant 0 : index
    %233 = vector.load %arg8[%232, %c0_73] : memref<8x32xf32, #tpu.memory_space<vmem>>, vector<1x32xf32>
    tpu.vector_store %arg8[%232, %c0_73], %231 {strides = array<i32>} : memref<8x32xf32, #tpu.memory_space<vmem>>, vector<1x32xf32>,
    %c6_i32 = arith.constant 6 : i32
    %234 = arith.index_cast %c6_i32 : i32 to index
    %c0_74 = arith.constant 0 : index
    %235 = vector.load %arg10[%234, %c0_74] : memref<8x96xf32, #tpu.memory_space<vmem>>, vector<1x96xf32>
    %cst_75 = arith.constant dense<0.000000e+00> : vector<1x96xf32>
    %236 = tpu.matmul %231, %39, %cst_75 {dimension_numbers = #tpu.dot_dimension_numbers<[1], [0], [0], [1], [0, 0, 1, 1], [], []>} : vector<1x32xf32>, vector<32x96xf32>, vector<1x96xf32> -> vector<1x96xf32>
    %237 = arith.addf %236, %40 : vector<1x96xf32>
    %238 = vector.extract_strided_slice %235 {offsets = [0, 0], sizes = [1, 32], strides = [1, 1]} : vector<1x96xf32> to vector<1x32xf32>
    %239 = vector.extract_strided_slice %237 {offsets = [0, 0], sizes = [1, 32], strides = [1, 1]} : vector<1x96xf32> to vector<1x32xf32>
    %240 = arith.addf %238, %239 : vector<1x32xf32>
    %241 = arith.negf %240 : vector<1x32xf32>
    %242 = math.exp %241 : vector<1x32xf32>
    %cst_76 = arith.constant 1.000000e+00 : f32
    %243 = vector.broadcast %cst_76 : f32 to vector<1x32xf32>
    %244 = arith.addf %243, %242 : vector<1x32xf32>
    %245 = arith.divf %243, %244 : vector<1x32xf32>
    %246 = vector.extract_strided_slice %235 {offsets = [0, 32], sizes = [1, 32], strides = [1, 1]} : vector<1x96xf32> to vector<1x32xf32>
    %247 = vector.extract_strided_slice %237 {offsets = [0, 32], sizes = [1, 32], strides = [1, 1]} : vector<1x96xf32> to vector<1x32xf32>
    %248 = arith.addf %246, %247 : vector<1x32xf32>
    %249 = arith.negf %248 : vector<1x32xf32>
    %250 = math.exp %249 : vector<1x32xf32>
    %cst_77 = arith.constant 1.000000e+00 : f32
    %251 = vector.broadcast %cst_77 : f32 to vector<1x32xf32>
    %252 = arith.addf %251, %250 : vector<1x32xf32>
    %253 = arith.divf %251, %252 : vector<1x32xf32>
    %254 = vector.extract_strided_slice %235 {offsets = [0, 64], sizes = [1, 32], strides = [1, 1]} : vector<1x96xf32> to vector<1x32xf32>
    %255 = vector.extract_strided_slice %237 {offsets = [0, 64], sizes = [1, 32], strides = [1, 1]} : vector<1x96xf32> to vector<1x32xf32>
    %256 = arith.mulf %245, %255 : vector<1x32xf32>
    %257 = arith.addf %254, %256 : vector<1x32xf32>
    %258 = math.tanh %257 : vector<1x32xf32>
    %cst_78 = arith.constant 1.000000e+00 : f32
    %259 = vector.broadcast %cst_78 : f32 to vector<1x32xf32>
    %260 = arith.subf %259, %253 : vector<1x32xf32>
    %261 = arith.mulf %260, %258 : vector<1x32xf32>
    %262 = arith.mulf %253, %231 : vector<1x32xf32>
    %263 = arith.addf %261, %262 : vector<1x32xf32>
    %264 = arith.index_cast %c6_i32 : i32 to index
    %c0_79 = arith.constant 0 : index
    %265 = vector.load %arg8[%264, %c0_79] : memref<8x32xf32, #tpu.memory_space<vmem>>, vector<1x32xf32>
    tpu.vector_store %arg8[%264, %c0_79], %263 {strides = array<i32>} : memref<8x32xf32, #tpu.memory_space<vmem>>, vector<1x32xf32>,
    %c7_i32 = arith.constant 7 : i32
    %266 = arith.index_cast %c7_i32 : i32 to index
    %c0_80 = arith.constant 0 : index
    %267 = vector.load %arg10[%266, %c0_80] : memref<8x96xf32, #tpu.memory_space<vmem>>, vector<1x96xf32>
    %cst_81 = arith.constant dense<0.000000e+00> : vector<1x96xf32>
    %268 = tpu.matmul %263, %39, %cst_81 {dimension_numbers = #tpu.dot_dimension_numbers<[1], [0], [0], [1], [0, 0, 1, 1], [], []>} : vector<1x32xf32>, vector<32x96xf32>, vector<1x96xf32> -> vector<1x96xf32>
    %269 = arith.addf %268, %40 : vector<1x96xf32>
    %270 = vector.extract_strided_slice %267 {offsets = [0, 0], sizes = [1, 32], strides = [1, 1]} : vector<1x96xf32> to vector<1x32xf32>
    %271 = vector.extract_strided_slice %269 {offsets = [0, 0], sizes = [1, 32], strides = [1, 1]} : vector<1x96xf32> to vector<1x32xf32>
    %272 = arith.addf %270, %271 : vector<1x32xf32>
    %273 = arith.negf %272 : vector<1x32xf32>
    %274 = math.exp %273 : vector<1x32xf32>
    %cst_82 = arith.constant 1.000000e+00 : f32
    %275 = vector.broadcast %cst_82 : f32 to vector<1x32xf32>
    %276 = arith.addf %275, %274 : vector<1x32xf32>
    %277 = arith.divf %275, %276 : vector<1x32xf32>
    %278 = vector.extract_strided_slice %267 {offsets = [0, 32], sizes = [1, 32], strides = [1, 1]} : vector<1x96xf32> to vector<1x32xf32>
    %279 = vector.extract_strided_slice %269 {offsets = [0, 32], sizes = [1, 32], strides = [1, 1]} : vector<1x96xf32> to vector<1x32xf32>
    %280 = arith.addf %278, %279 : vector<1x32xf32>
    %281 = arith.negf %280 : vector<1x32xf32>
    %282 = math.exp %281 : vector<1x32xf32>
    %cst_83 = arith.constant 1.000000e+00 : f32
    %283 = vector.broadcast %cst_83 : f32 to vector<1x32xf32>
    %284 = arith.addf %283, %282 : vector<1x32xf32>
    %285 = arith.divf %283, %284 : vector<1x32xf32>
    %286 = vector.extract_strided_slice %267 {offsets = [0, 64], sizes = [1, 32], strides = [1, 1]} : vector<1x96xf32> to vector<1x32xf32>
    %287 = vector.extract_strided_slice %269 {offsets = [0, 64], sizes = [1, 32], strides = [1, 1]} : vector<1x96xf32> to vector<1x32xf32>
    %288 = arith.mulf %277, %287 : vector<1x32xf32>
    %289 = arith.addf %286, %288 : vector<1x32xf32>
    %290 = math.tanh %289 : vector<1x32xf32>
    %cst_84 = arith.constant 1.000000e+00 : f32
    %291 = vector.broadcast %cst_84 : f32 to vector<1x32xf32>
    %292 = arith.subf %291, %285 : vector<1x32xf32>
    %293 = arith.mulf %292, %290 : vector<1x32xf32>
    %294 = arith.mulf %285, %263 : vector<1x32xf32>
    %295 = arith.addf %293, %294 : vector<1x32xf32>
    %296 = arith.index_cast %c7_i32 : i32 to index
    %c0_85 = arith.constant 0 : index
    %297 = vector.load %arg8[%296, %c0_85] : memref<8x32xf32, #tpu.memory_space<vmem>>, vector<1x32xf32>
    tpu.vector_store %arg8[%296, %c0_85], %295 {strides = array<i32>} : memref<8x32xf32, #tpu.memory_space<vmem>>, vector<1x32xf32>,
    %c8_i32 = arith.constant 8 : i32
    return
  }
  func.func @transform_0(%arg0: i32, %arg1: memref<8xi32, #tpu.memory_space<smem>>) -> (i32, i32) {
    %c0_i32 = arith.constant 0 : i32
    %c0_i32_0 = arith.constant 0 : i32
    %c0_i32_1 = arith.constant 0 : i32
    return %c0_i32, %c0_i32_0 : i32, i32
  }
  func.func @transform_1(%arg0: i32, %arg1: memref<8xi32, #tpu.memory_space<smem>>) -> (i32, i32) {
    %c0_i32 = arith.constant 0 : i32
    %c0_i32_0 = arith.constant 0 : i32
    %c0_i32_1 = arith.constant 0 : i32
    return %c0_i32, %c0_i32_0 : i32, i32
  }
  func.func @transform_2(%arg0: i32, %arg1: memref<8xi32, #tpu.memory_space<smem>>) -> (i32, i32) {
    %c0_i32 = arith.constant 0 : i32
    %c0_i32_0 = arith.constant 0 : i32
    %c0_i32_1 = arith.constant 0 : i32
    return %c0_i32, %c0_i32_0 : i32, i32
  }
  func.func @transform_3(%arg0: i32, %arg1: memref<8xi32, #tpu.memory_space<smem>>) -> (i32, i32) {
    %c0_i32 = arith.constant 0 : i32
    %c0_i32_0 = arith.constant 0 : i32
    %c0_i32_1 = arith.constant 0 : i32
    return %c0_i32, %c0_i32_0 : i32, i32
  }
  func.func @transform_4(%arg0: i32, %arg1: memref<8xi32, #tpu.memory_space<smem>>) -> (i32, i32) {
    %c0_i32 = arith.constant 0 : i32
    %c0_i32_0 = arith.constant 0 : i32
    %c0_i32_1 = arith.constant 0 : i32
    return %c0_i32, %c0_i32_0 : i32, i32
  }
  func.func @transform_5(%arg0: i32, %arg1: memref<8xi32, #tpu.memory_space<smem>>) -> (i32, i32) {
    %c0_i32 = arith.constant 0 : i32
    %c0_i32_0 = arith.constant 0 : i32
    %c0_i32_1 = arith.constant 0 : i32
    return %c0_i32, %c0_i32_0 : i32, i32
  }
  func.func @transform_6(%arg0: i32, %arg1: memref<8xi32, #tpu.memory_space<smem>>) -> (i32, i32) {
    %c0_i32 = arith.constant 0 : i32
    %c0_i32_0 = arith.constant 0 : i32
    %c0_i32_1 = arith.constant 0 : i32
    return %c0_i32, %c0_i32_0 : i32, i32
  }
}

</mosaic_0001>

<bundles_post_ra>
// kernel: encoder_rnn_sequence.1
= control target key start
LH: loop header
LB: loop body
LE: loop exit
PB: predicated region body
PF: predicated region fallthrough
CT: control target
= control target key end

     0   :  { %s1694_s0 = inlined_call_operand.vmem [shape: s32[8], index: 0, kind: input, shape index: {}]   ;;  %s1695_s1 = inlined_call_operand.hbm [shape: f32[16,32], index: 1, kind: input, shape index: {}]   ;;  %s1696_s2 = inlined_call_operand.vmem [shape: f32[1,32], index: 2, kind: input, shape index: {}]   ;;  %s1697_s3 = inlined_call_operand.hbm [shape: f32[32,96], index: 3, kind: input, shape index: {}]   ;;  %s1698_s4 = inlined_call_operand.hbm [shape: f32[32,96], index: 4, kind: input, shape index: {}]   ;;  %s1699_s5 = inlined_call_operand.vmem [shape: f32[1,96], index: 5, kind: input, shape index: {}]   ;;  %s1700_s6 = inlined_call_operand.vmem [shape: f32[1,96], index: 6, kind: input, shape index: {}]   ;;  %s1701_s7 = inlined_call_operand.vmem [shape: f32[8,32], index: 7, kind: output, shape index: {}]  }
   0x1   :  { %s12_s26 = sshll.u32 %s1694_s0, 4  ;;  %s13_s26 = int_to_ptr.vmem [resolvable:$true] %s12_s26 }
   0x2   :  { %s1335_s27 = scalar_lea.vmem %s13_s26, 16  ;;  %p1340_p1 = scmp.lt.s32.totalorder %s13_s26, %s13_s26 }
   0x3   :  { %p1336_p0 = scmp.ne.s32.totalorder %s13_s26, %s1335_s27  ;;  %p1341_p2 = scmp.lt.s32.totalorder %s1335_s27, %s1335_s27 }
   0x5   :  { %p1342_p3 = por %p1341_p2, %p1340_p1 }
   0x7   :  { %p1343_p4 = pnand %p1342_p3, %p1336_p0 }
   0x9   :  { %1346 = shalt.err (!%p1343_p4)  }
   0xa   :  { %s1419_s28 = smov [#allocation5]  }
   0xb   :  { %15 = dma.vmem_to_smem %s13_s26, 16, %s1419_s28, [#allocation4] }
   0xc   :  { %1413 = dma.done.wait [#allocation4], 16 }
   0xd   :  { %1414 = vsyncadd [#allocation4], 4294967280 }
   0xe   :  { %17 = sfence }
   0xf   :  { %18 = vsyncpa [#allocation7], 0 }
  0x10   :  { %19 = vsyncpa [#allocation9], 0  ;;  %s1420_s29 = smov [#allocation8]   ;;  %s1421_s8 = smov [#allocation6]  }
  0x11   :  { %s39_s30 = sshll.u32 %s1420_s29, 4  ;;  %s25_s9 = sshll.u32 %s1421_s8, 4  ;;  %s40_s30 = int_to_ptr.vmem [resolvable:$true] %s39_s30  ;;  %s1474_s9 = int_to_ptr.vmem [resolvable:$true] %s25_s9 }
  0x12   :  { %s1347_s11 = scalar_lea.hbm %s1697_s3, 512 }
  0x13   :  { %p1348_p5 = scmp.ne.s32.totalorder %s1697_s3, %s1347_s11  ;;  %p1351_p6 = scmp.lt.u32.totalorder %s1347_s11, %s1697_s3 }
  0x15   :  { %p1353_p7 = pnand %p1351_p6, %p1348_p5 }
  0x17   :  { %1356 = shalt.err (!%p1353_p7)
}
  0x18   :  { %s1357_s16 = scalar_lea.vmem %s40_s30, 512  ;;  %p1362_p9 = scmp.lt.s32.totalorder %s40_s30, %s40_s30 }
  0x19   :  { %p1358_p8 = scmp.ne.s32.totalorder %s40_s30, %s1357_s16  ;;  %p1363_p10 = scmp.lt.s32.totalorder %s1357_s16, %s1357_s16 }
  0x1b   :  { %p1364_p11 = por %p1363_p10, %p1362_p9 }
  0x1d   :  { %p1365_p12 = pnand %p1364_p11, %p1358_p8 }
  0x1f   :  { %1368 = shalt.err (!%p1365_p12)
}
  0x20   :  { %s1422_s17 = smov 128   ;;  %s1423_s18 = smov 8  }
  0x21   :  { %45 = dma.hbm_to_vmem [thread:$0]  %s1697_s3, 512, %s40_s30, [#allocation9], %s1422_s17, %s1422_s17, %s1423_s18  }
  0x22   :  { %s1369_s23 = scalar_lea.hbm %s1695_s1, 256 }
  0x23   :  { %p1370_p13 = scmp.ne.s32.totalorder %s1695_s1, %s1369_s23  ;;  %p1373_p0 = scmp.lt.u32.totalorder %s1369_s23, %s1695_s1 }
  0x25   :  { %p1375_p1 = pnand %p1373_p0, %p1370_p13 }
  0x27   :  { %1378 = shalt.err (!%p1375_p1)
}
  0x28   :  { %s1379_s28 = scalar_lea.vmem %s1474_s9, 256  ;;  %p1384_p3 = scmp.lt.s32.totalorder %s1474_s9, %s1474_s9 }
  0x29   :  { %p1380_p2 = scmp.ne.s32.totalorder %s1474_s9, %s1379_s28  ;;  %p1385_p4 = scmp.lt.s32.totalorder %s1379_s28, %s1379_s28 }
  0x2b   :  { %p1386_p5 = por %p1385_p4, %p1384_p3 }
  0x2d   :  { %p1387_p6 = pnand %p1386_p5, %p1380_p2 }
  0x2f   :  { %1390 = shalt.err (!%p1387_p6)
}
  0x30   :  { %31 = dma.hbm_to_vmem [thread:$0]  %s1695_s1, 256, %s1474_s9, [#allocation7], %s1422_s17, %s1422_s17, %s1423_s18  }
  0x31   :  { %s1424_s30 = smov [#allocation10]   ;;  %s1391_s11 = scalar_lea.hbm %s1698_s4, 512 }
  0x32   :  { %s51_s8 = sshll.u32 %s1424_s30, 4  ;;  %p1392_p7 = scmp.ne.s32.totalorder %s1698_s4, %s1391_s11  ;;  %s52_s8 = int_to_ptr.vmem [resolvable:$true] %s51_s8 }
  0x33   :  { %p1395_p8 = scmp.lt.u32.totalorder %s1391_s11, %s1698_s4 }
  0x35   :  { %p1397_p9 = pnand %p1395_p8, %p1392_p7 }
  0x37   :  { %1400 = shalt.err (!%p1397_p9)
}
  0x38   :  { %s1401_s16 = scalar_lea.vmem %s52_s8, 512  ;;  %p1406_p11 = scmp.lt.s32.totalorder %s52_s8, %s52_s8 }
  0x39   :  { %p1402_p10 = scmp.ne.s32.totalorder %s52_s8, %s1401_s16  ;;  %p1407_p12 = scmp.lt.s32.totalorder %s1401_s16, %s1401_s16 }
  0x3b   :  { %p1408_p13 = por %p1407_p12, %p1406_p11 }
  0x3d   :  { %p1409_p0 = pnand %p1408_p13, %p1402_p10 }
  0x3f   :  { %1412 = shalt.err (!%p1409_p0)
}
  0x40   :  { %57 = dma.hbm_to_vmem [thread:$0]  %s1698_s4, 512, %s52_s8, [#allocation9], %s1422_s17, %s1422_s17, %s1423_s18  }
  0x41   :  { %1415 = dma.done.wait [#allocation7], 256  }
  0x42   :  { %1416 = vsyncadd [#allocation7], 4294967040 }
  0x43   :  { %1417 = dma.done.wait [#allocation9], 1024  }
  0x44   :  { %1418 = vsyncadd [#allocation9], 4294966272  ;;  %v1425_v0 = vmov 0.0|0.0   ;;  %s71_s19 = sld [smem:[#allocation5]]  ;;  %s1052_s20 = sld [smem:[#allocation5 + $0x1]]  ;;  %vm1426_vm0 = vmmov 0   ;;  %v296_v42 = vlaneseq }
  0x45   :  { %1221 = vmatprep.subr.bf16.mxu0 %v1425_v0  ;;  %1227 = vmatprep.subr.bf16.mxu1 %v1425_v0  ;;  %v1427_v1 = vmov 0.0   ;;  %s1053_s4 = sld [smem:[#allocation5 + $0x2]]  ;;  %s1054_s17 = sld [smem:[#allocation5 + $0x3]]  ;;  %v105_v2 = vld [vmem:[#allocation8] sm:$0xff]  ;;  %v106_v3 = vld [vmem:[#allocation8 + $0x8] sm:$0xff]  ;;  %vm74_vm1 = vcmask 253952  }
  0x46   :  { %1130 = vmatprep.mubr.msk.f32.mxu0 %vm1426_vm0, %v1427_v1  ;;  %1141 = vmatprep.mubr.msk.f32.mxu1 %vm1426_vm0, %v1427_v1  ;;  %s1532_s18 = sld [smem:[#allocation5 + $0x4]]  ;;  %s1534_s21 = sld [smem:[#allocation5 + $0x5]]  ;;  %v192_v4 = vld [vmem:[#allocation10] sm:$0xff]  ;;  %v1222_v5 = vpack.c.bf16 %v106_v3, %v105_v2  ;;  %v193_v6 = vld [vmem:[#allocation10 + $0x8] sm:$0xff]  ;;  %v107_v7 = vld [vmem:[#allocation8 + $0x10] sm:$0xff]  ;;  %vm116_vm2 = vcmask 261120  }
  0x47   :  { %s1536_s22 = sld [smem:[#allocation5 + $0x6]]  ;;  %s1538_s23 = sld [smem:[#allocation5 + $0x7]]  ;;  %v108_v8 = vld [vmem:[#allocation8 + $0x18] sm:$0xff]  ;;  %v1540_v9 = vpack.c.bf16 %v193_v6, %v192_v4  ;;  %v194_v10 = vld [vmem:[#allocation10 + $0x10] sm:$0xff]  ;;  %v197_v22 = vld [vmem:[%s1696_s2] sm:$0x1] }
  0x48   :  { %v195_v11 = vld [vmem:[#allocation10 + $0x18] sm:$0xff]  ;;  %1223 = vmatpush3.bf16.msra.mxu0 %v1222_v5  ;;  %v1225_v13 = vpack.c.bf16 %v108_v8, %v107_v7  ;;  %v1582_v24 = vld [vmem:[%s1700_s6] sm:$0x1]  ;;  %vm190_vm3 = vcmask 785408   ;;  %s1428_s13 = smov 64   ;;  %v297_v43 = vshrl.u32 %v296_v42, 7 }
  0x49   :  { %1229 = vmatpush3.bf16.msra.mxu1 %v1540_v9  ;;  %1224 = vmatprep.subr.bf16.mxu0 %v1425_v0  ;;  %v1545_v17 = vpack.c.bf16 %v195_v11, %v194_v10  ;;  %v1059_v26 = vld [vmem:[%s1699_s5] ss:$0 sm:$0xff]  ;;  %s1429_s5 = smov 96   ;;  %s1430_s6 = smov 32  }
  0x4a   :  { %s72_s24 = scalar_lea.vmem [#allocation6], %s71_s19  ;;  %s77_s25 = scalar_lea.vmem [#allocation6], %s1052_s20  ;;  %1230 = vmatprep.subr.bf16.mxu1 %v1425_v0  ;;  %v298_v44 = vsub.s32 0, %v297_v43 }
  0x4b   :  { %v73_v12 = vld [vmem:[%s72_s24] sm:$0x1]  ;;  %s81_s26 = scalar_lea.vmem [#allocation6], %s1053_s4  ;;  %s85_s27 = scalar_lea.vmem [#allocation6], %s1054_s17 }
  0x4c   :  { %75 = vst.msk [vmem:[#allocation2] sm:$0x1] %vm74_vm1, %v73_v12  ;;  %v78_v14 = vld [vmem:[%s77_s25] sm:$0x1]  ;;  %s89_s28 = scalar_lea.vmem [#allocation6], %s1532_s18  ;;  %s93_s3 = scalar_lea.vmem [#allocation6], %s1534_s21  ;;  %1226 = vmatpush3.bf16.msra.mxu0 %v1225_v13  ;;  %v299_v46 = vrot.slane %v197_v22, %v298_v44 }
  0x4d   :  { %v82_v15 = vld [vmem:[%s81_s26] sm:$0x1]  ;;  %79 = vst.msk [vmem:[#allocation2 + $0x1] sm:$0x1] %vm74_vm1, %v78_v14  ;;  %s97_s29 = scalar_lea.vmem [#allocation6], %s1536_s22  ;;  %s101_s30 = scalar_lea.vmem [#allocation6], %s1538_s23  ;;  %1232 = vmatpush3.bf16.msra.mxu1 %v1545_v17  ;;  %1233 = vmatprep.subr.bf16.mxu0 %v1425_v0 }
  0x4e   :  { %v86_v16 = vld [vmem:[%s85_s27] sm:$0x1]  ;;  %83 = vst.msk [vmem:[#allocation2 + $0x2] sm:$0x1] %vm74_vm1, %v82_v15  ;;  %1239 = vmatprep.subr.bf16.mxu1 %v1425_v0 }
  0x4f   :  { %87 = vst.msk [vmem:[#allocation2 + $0x3] sm:$0x1] %vm74_vm1, %v86_v16  ;;  %v90_v18 = vld [vmem:[%s89_s28] sm:$0x1] }
  0x50   :  { %v94_v19 = vld [vmem:[%s93_s3] sm:$0x1]  ;;  %91 = vst.msk [vmem:[#allocation2 + $0x4] sm:$0x1] %vm74_vm1, %v90_v18  ;;  %1142 = vmatmul.mubr.msk.f32.vlgmr.msra.gmra.mrb[0].mxu1 %vm116_vm2, %v197_v22 }
  0x51   :  { %95 = vst.msk [vmem:[#allocation2 + $0x5] sm:$0x1] %vm74_vm1, %v94_v19  ;;  %v98_v20 = vld [vmem:[%s97_s29] sm:$0x1]  ;;  %1241 = vmatpush3.bf16.msra.mxu1 %v1540_v9  ;;  %1163 = vmatprep.mubr.msk.f32.mxu1 %vm1426_vm0, %v1427_v1 }
  0x52   :  { %v102_v21 = vld [vmem:[%s101_s30] sm:$0x1]  ;;  %99 = vst.msk [vmem:[#allocation2 + $0x6] sm:$0x1] %vm74_vm1, %v98_v20  ;;  %1242 = vmatprep.subr.bf16.mxu1 %v1425_v0 }
  0x53   :  { %103 = vst.msk [vmem:[#allocation2 + $0x7] sm:$0x1] %vm74_vm1, %v102_v21 }
  0x55   :  { %1244 = vmatpush3.bf16.msra.mxu1 %v1545_v17 }
  0x56   :  { %1251 = vmatprep.subr.bf16.mxu1 %v1425_v0 }
  0x5a   :  { %v104_v23 = vld [vmem:[#allocation2] sm:$0xff] }
  0x5b   :  { %1131 = vmatmul.mubr.msk.f32.vlgmr.msra.gmra.mrb[0].mxu0 %vm116_vm2, %v104_v23 }
  0x5c   :  { %1235 = vmatpush3.bf16.msra.mxu0 %v1540_v9  ;;  %1152 = vmatprep.mubr.msk.f32.mxu0 %vm1426_vm0, %v1427_v1 }
  0x5d   :  { %1236 = vmatprep.subr.bf16.mxu0 %v1425_v0 }
  0x60   :  { %1238 = vmatpush3.bf16.msra.mxu0 %v1545_v17 }
  0x61   :  { %1245 = vmatprep.subr.bf16.mxu0 %v1425_v0 }
 0x123   :  { %v268_v25 = vpop.f32.mrb[0].mxu1 }
 0x124   :  { %v269_v27 = vadd.f32 %v268_v25, %v1582_v24  ;;  %v1143_v28 = vpop.f32.mrb[1].mxu1 }
 0x126   :  { %280 = vrot.lane.b32.xlu0 %v269_v27, %s1428_s13 }
 0x12e   :  { %v186_v29 = vpop.f32.mrb[0].mxu0 }
 0x12f   :  { %v187_v30 = vadd.f32 %v1059_v26, %v186_v29  ;;  %v1132_v31 = vpop.f32.mrb[1].mxu0 }
 0x131   :  { %191 = vst.msk [vmem:[#allocation3] sm:$0xff] %vm190_vm3, %v187_v30 }
 0x138   :  { %v198_v32 = vld [vmem:[#allocation3] sm:$0x1]  ;;  %v310_v57 = vld [vmem:[#allocation3 + $0x1] sm:$0x1]  ;;  %v414_v16 = vld [vmem:[#allocation3 + $0x2] sm:$0x1] }
 0x139   :  { %v272_v33 = vadd.f32 %v269_v27, %v198_v32 }
 0x13b   :  { %v1062_v34 = vmul.f32 -1.442695, %v272_v33 }
 0x13d   :  { %1287 = vpow2.f32 %v1062_v34 }
 0x147   :  { %v1288_v35 = vpop.eup %1287 }
 0x148   :  { %v276_v36 = vadd.f32 1.0, %v1288_v35 }
 0x14a   :  { %1289 = vrcp.f32 %v276_v36 }
 0x154   :  { %v1290_v37 = vpop.eup %1289 }
 0x155   :  { %v290_v48 = vsub.f32 1.0, %v1290_v37 }
 0x198   :  { %v281_v38 = vpop.permute.xlu0 %280 }
 0x199   :  { %v283_v39 = vmul.f32 %v1290_v37, %v281_v38  ;;  %v518_v38 = vld [vmem:[#allocation3 + $0x3] sm:$0x1] }
 0x19b   :  { %285 = vrot.lane.b32.xlu0 %v283_v39, %s1428_s13 }
 0x20d   :  { %v286_v40 = vpop.permute.xlu0 %285 }
 0x20e   :  { %v288_v41 = vadd.f32 %v286_v40, %v198_v32 }
 0x210   :  { %1291 = vtanh.f32 %v288_v41 }
 0x21a   :  { %v1292_v45 = vpop.eup %1291 }
 0x21b   :  { %292 = vrot.lane.b32.xlu1 %v1292_v45, %s1429_s5 }
 0x21f   :  { %300 = vrot.lane.b32.xlu1 %v299_v46, %s1430_s6 }
 0x28d   :  { %v293_v47 = vpop.permute.xlu1 %292 }
 0x28e   :  { %v295_v50 = vmul.f32 %v293_v47, %v290_v48 }
 0x291   :  { %v301_v49 = vpop.permute.xlu1 %300 }
 0x292   :  { %v303_v51 = vmul.f32 %v1290_v37, %v301_v49 }
 0x294   :  { %v304_v52 = vadd.f32 %v303_v51, %v295_v50 }
 0x296   :  { %306 = vrot.lane.b32.xlu0 %v304_v52, %s1429_s5 }
 0x308   :  { %v307_v53 = vpop.permute.xlu0 %306 }
 0x309   :  { %309 = vst.msk [vmem:[%s1701_s7] sm:$0x1] %vm74_vm1, %v307_v53  ;;  %1153 = vmatmul.mubr.msk.f32.vlgmr.msra.gmra.mrb[2].mxu0 %vm116_vm2, %v307_v53 }
 0x30a   :  { %1247 = vmatpush3.bf16.msra.mxu0 %v1540_v9  ;;  %1174 = vmatprep.mubr.msk.f32.mxu0 %vm1426_vm0, %v1427_v1 }
 0x30b   :  { %1248 = vmatprep.subr.bf16.mxu0 %v1425_v0 }
 0x30e   :  { %1250 = vmatpush3.bf16.msra.mxu0 %v1545_v17 }
 0x30f   :  { %1257 = vmatprep.subr.bf16.mxu0 %v1425_v0 }
 0x3dc   :  { %v379_v54 = vpop.f32.mrb[2].mxu0 }
 0x3dd   :  { %v380_v55 = vadd.f32 %v379_v54, %v1582_v24  ;;  %v1154_v56 = vpop.f32.mrb[3].mxu0 }
 0x3df   :  { %391 = vrot.lane.b32.xlu1 %v380_v55, %s1428_s13  ;;  %v383_v58 = vadd.f32 %v380_v55, %v310_v57 }
 0x3e1   :  { %v1064_v59 = vmul.f32 -1.442695, %v383_v58  ;;  %v622_v58 = vld [vmem:[#allocation3 + $0x4] sm:$0x1] }
 0x3e3   :  { %1293 = vpow2.f32 %v1064_v59 }
 0x3ed   :  { %v1294_v60 = vpop.eup %1293 }
 0x3ee   :  { %v387_v61 = vadd.f32 1.0, %v1294_v60 }
 0x3f0   :  { %1295 = vrcp.f32 %v387_v61 }
 0x3fa   :  { %v1296_v62 = vpop.eup %1295 }
 0x3fb   :  { %v401_v6 = vsub.f32 1.0, %v1296_v62  ;;  %v407_v8 = vmul.f32 %v1296_v62, %v304_v52 }
 0x451   :  { %v392_v63 = vpop.permute.xlu1 %391 }
 0x452   :  { %v394_v2 = vmul.f32 %v1296_v62, %v392_v63 }
 0x454   :  { %396 = vrot.lane.b32.xlu0 %v394_v2, %s1428_s13 }
 0x4c6   :  { %v397_v3 = vpop.permute.xlu0 %396 }
 0x4c7   :  { %v399_v4 = vadd.f32 %v397_v3, %v310_v57 }
 0x4c9   :  { %1297 = vtanh.f32 %v399_v4 }
 0x4d3   :  { %v1298_v5 = vpop.eup %1297 }
 0x4d4   :  { %403 = vrot.lane.b32.xlu1 %v1298_v5, %s1429_s5 }
 0x546   :  { %v404_v7 = vpop.permute.xlu1 %403 }
 0x547   :  { %v406_v10 = vmul.f32 %v404_v7, %v401_v6 }
 0x549   :  { %v408_v11 = vadd.f32 %v407_v8, %v406_v10 }
 0x54b   :  { %410 = vrot.lane.b32.xlu0 %v408_v11, %s1429_s5 }
 0x5bd   :  { %v411_v12 = vpop.permute.xlu0 %410 }
 0x5be   :  { %413 = vst.msk [vmem:[%s1701_s7 + $0x1] sm:$0x1] %vm74_vm1, %v411_v12  ;;  %1164 = vmatmul.mubr.msk.f32.vlgmr.msra.gmra.mrb[2].mxu1 %vm116_vm2, %v411_v12 }
 0x5bf   :  { %1253 = vmatpush3.bf16.msra.mxu1 %v1540_v9  ;;  %1185 = vmatprep.mubr.msk.f32.mxu1 %vm1426_vm0, %v1427_v1 }
 0x5c0   :  { %1254 = vmatprep.subr.bf16.mxu1 %v1425_v0 }
 0x5c3   :  { %1256 = vmatpush3.bf16.msra.mxu1 %v1545_v17 }
 0x5c4   :  { %1263 = vmatprep.subr.bf16.mxu1 %v1425_v0 }
 0x691   :  { %v483_v13 = vpop.f32.mrb[2].mxu1 }
 0x692   :  { %v484_v14 = vadd.f32 %v483_v13, %v1582_v24  ;;  %v1165_v15 = vpop.f32.mrb[3].mxu1 }
 0x694   :  { %495 = vrot.lane.b32.xlu1 %v484_v14, %s1428_s13  ;;  %v487_v18 = vadd.f32 %v484_v14, %v414_v16 }
 0x696   :  { %v1066_v19 = vmul.f32 -1.442695, %v487_v18  ;;  %v726_v18 = vld [vmem:[#allocation3 + $0x5] sm:$0x1] }
 0x698   :  { %1299 = vpow2.f32 %v1066_v19 }
 0x6a2   :  { %v1300_v20 = vpop.eup %1299 }
 0x6a3   :  { %v491_v21 = vadd.f32 1.0, %v1300_v20 }
 0x6a5   :  { %1301 = vrcp.f32 %v491_v21 }
 0x6af   :  { %v1302_v22 = vpop.eup %1301 }
 0x6b0   :  { %v505_v29 = vsub.f32 1.0, %v1302_v22  ;;  %v511_v31 = vmul.f32 %v1302_v22, %v408_v11 }
 0x706   :  { %v496_v23 = vpop.permute.xlu1 %495 }
 0x707   :  { %v498_v25 = vmul.f32 %v1302_v22, %v496_v23 }
 0x709   :  { %500 = vrot.lane.b32.xlu0 %v498_v25, %s1428_s13 }
 0x77b   :  { %v501_v26 = vpop.permute.xlu0 %500 }
 0x77c   :  { %v503_v27 = vadd.f32 %v501_v26, %v414_v16 }
 0x77e   :  { %1303 = vtanh.f32 %v503_v27 }
 0x788   :  { %v1304_v28 = vpop.eup %1303 }
 0x789   :  { %507 = vrot.lane.b32.xlu1 %v1304_v28, %s1429_s5 }
 0x7fb   :  { %v508_v30 = vpop.permute.xlu1 %507 }
 0x7fc   :  { %v510_v32 = vmul.f32 %v508_v30, %v505_v29 }
 0x7fe   :  { %v512_v33 = vadd.f32 %v511_v31, %v510_v32 }
 0x800   :  { %514 = vrot.lane.b32.xlu0 %v512_v33, %s1429_s5 }
 0x872   :  { %v515_v34 = vpop.permute.xlu0 %514 }
 0x873   :  { %517 = vst.msk [vmem:[%s1701_s7 + $0x2] sm:$0x1] %vm74_vm1, %v515_v34  ;;  %1175 = vmatmul.mubr.msk.f32.vlgmr.msra.gmra.mrb[4].mxu0 %vm116_vm2, %v515_v34 }
 0x874   :  { %1259 = vmatpush3.bf16.msra.mxu0 %v1540_v9  ;;  %1196 = vmatprep.mubr.msk.f32.mxu0 %vm1426_vm0, %v1427_v1 }
 0x875   :  { %1260 = vmatprep.subr.bf16.mxu0 %v1425_v0 }
 0x878   :  { %1262 = vmatpush3.bf16.msra.mxu0 %v1545_v17 }
 0x879   :  { %1269 = vmatprep.subr.bf16.mxu0 %v1425_v0 }
 0x946   :  { %v587_v35 = vpop.f32.mrb[4].mxu0 }
 0x947   :  { %v588_v36 = vadd.f32 %v587_v35, %v1582_v24  ;;  %v1176_v37 = vpop.f32.mrb[5].mxu0  ;;  %v830_v35 = vld [vmem:[#allocation3 + $0x6] sm:$0x1] }
 0x949   :  { %599 = vrot.lane.b32.xlu1 %v588_v36, %s1428_s13  ;;  %v591_v39 = vadd.f32 %v588_v36, %v518_v38 }
 0x94b   :  { %v1068_v40 = vmul.f32 -1.442695, %v591_v39 }
 0x94d   :  { %1305 = vpow2.f32 %v1068_v40 }
 0x957   :  { %v1306_v41 = vpop.eup %1305 }
 0x958   :  { %v595_v42 = vadd.f32 1.0, %v1306_v41 }
 0x95a   :  { %1307 = vrcp.f32 %v595_v42 }
 0x964   :  { %v1308_v43 = vpop.eup %1307 }
 0x965   :  { %v609_v49 = vsub.f32 1.0, %v1308_v43  ;;  %v615_v51 = vmul.f32 %v1308_v43, %v512_v33 }
 0x9bb   :  { %v600_v44 = vpop.permute.xlu1 %599 }
 0x9bc   :  { %v602_v45 = vmul.f32 %v1308_v43, %v600_v44 }
 0x9be   :  { %604 = vrot.lane.b32.xlu0 %v602_v45, %s1428_s13 }
 0xa30   :  { %v605_v46 = vpop.permute.xlu0 %604 }
 0xa31   :  { %v607_v47 = vadd.f32 %v605_v46, %v518_v38 }
 0xa33   :  { %1309 = vtanh.f32 %v607_v47 }
 0xa3d   :  { %v1310_v48 = vpop.eup %1309 }
 0xa3e   :  { %611 = vrot.lane.b32.xlu1 %v1310_v48, %s1429_s5 }
 0xab0   :  { %v612_v50 = vpop.permute.xlu1 %611 }
 0xab1   :  { %v614_v52 = vmul.f32 %v612_v50, %v609_v49 }
 0xab3   :  { %v616_v53 = vadd.f32 %v615_v51, %v614_v52 }
 0xab5   :  { %618 = vrot.lane.b32.xlu0 %v616_v53, %s1429_s5 }
 0xb27   :  { %v619_v54 = vpop.permute.xlu0 %618 }
 0xb28   :  { %621 = vst.msk [vmem:[%s1701_s7 + $0x3] sm:$0x1] %vm74_vm1, %v619_v54  ;;  %1186 = vmatmul.mubr.msk.f32.vlgmr.msra.gmra.mrb[4].mxu1 %vm116_vm2, %v619_v54 }
 0xb29   :  { %1265 = vmatpush3.bf16.msra.mxu1 %v1540_v9  ;;  %1207 = vmatprep.mubr.msk.f32.mxu1 %vm1426_vm0, %v1427_v1 }
 0xb2a   :  { %1266 = vmatprep.subr.bf16.mxu1 %v1425_v0 }
 0xb2d   :  { %1268 = vmatpush3.bf16.msra.mxu1 %v1545_v17 }
 0xbfb   :  { %v691_v55 = vpop.f32.mrb[4].mxu1 }
 0xbfc   :  { %v692_v56 = vadd.f32 %v691_v55, %v1582_v24  ;;  %v1187_v57 = vpop.f32.mrb[5].mxu1  ;;  %v934_v55 = vld [vmem:[#allocation3 + $0x7] sm:$0x1] }
 0xbfe   :  { %703 = vrot.lane.b32.xlu1 %v692_v56, %s1428_s13  ;;  %v695_v59 = vadd.f32 %v692_v56, %v622_v58 }
 0xc00   :  { %v1070_v60 = vmul.f32 -1.442695, %v695_v59 }
 0xc02   :  { %1311 = vpow2.f32 %v1070_v60 }
 0xc0c   :  { %v1312_v61 = vpop.eup %1311 }
 0xc0d   :  { %v699_v62 = vadd.f32 1.0, %v1312_v61 }
 0xc0f   :  { %1313 = vrcp.f32 %v699_v62 }
 0xc19   :  { %v1314_v63 = vpop.eup %1313 }
 0xc1a   :  { %v713_v7 = vsub.f32 1.0, %v1314_v63  ;;  %v719_v10 = vmul.f32 %v1314_v63, %v616_v53 }
 0xc70   :  { %v704_v2 = vpop.permute.xlu1 %703 }
 0xc71   :  { %v706_v3 = vmul.f32 %v1314_v63, %v704_v2 }
 0xc73   :  { %708 = vrot.lane.b32.xlu0 %v706_v3, %s1428_s13 }
 0xce5   :  { %v709_v4 = vpop.permute.xlu0 %708 }
 0xce6   :  { %v711_v5 = vadd.f32 %v709_v4, %v622_v58 }
 0xce8   :  { %1315 = vtanh.f32 %v711_v5 }
 0xcf2   :  { %v1316_v6 = vpop.eup %1315 }
 0xcf3   :  { %715 = vrot.lane.b32.xlu1 %v1316_v6, %s1429_s5 }
 0xd65   :  { %v716_v8 = vpop.permute.xlu1 %715 }
 0xd66   :  { %v718_v11 = vmul.f32 %v716_v8, %v713_v7 }
 0xd68   :  { %v720_v12 = vadd.f32 %v719_v10, %v718_v11 }
 0xd6a   :  { %722 = vrot.lane.b32.xlu0 %v720_v12, %s1429_s5 }
 0xddc   :  { %v723_v13 = vpop.permute.xlu0 %722 }
 0xddd   :  { %725 = vst.msk [vmem:[%s1701_s7 + $0x4] sm:$0x1] %vm74_vm1, %v723_v13  ;;  %1197 = vmatmul.mubr.msk.f32.vlgmr.msra.gmra.mrb[6].mxu0 %vm116_vm2, %v723_v13 }
 0xdde   :  { %1271 = vmatpush3.bf16.msra.mxu0 %v1540_v9  ;;  %1218 = vmatprep.mubr.msk.f32.mxu0 %vm1426_vm0, %v1427_v1 }
 0xddf   :  { %1272 = vmatprep.subr.bf16.mxu0 %v1425_v0 }
 0xde2   :  { %1274 = vmatpush3.bf16.msra.mxu0 %v1545_v17 }
 0xeb0   :  { %v795_v14 = vpop.f32.mrb[6].mxu0 }
 0xeb1   :  { %v796_v15 = vadd.f32 %v795_v14, %v1582_v24  ;;  %v1198_v16 = vpop.f32.mrb[7].mxu0 }
 0xeb3   :  { %807 = vrot.lane.b32.xlu1 %v796_v15, %s1428_s13  ;;  %v799_v19 = vadd.f32 %v796_v15, %v726_v18 }
 0xeb5   :  { %v1072_v20 = vmul.f32 -1.442695, %v799_v19 }
 0xeb7   :  { %1317 = vpow2.f32 %v1072_v20 }
 0xec1   :  { %v1318_v21 = vpop.eup %1317 }
 0xec2   :  { %v803_v22 = vadd.f32 1.0, %v1318_v21 }
 0xec4   :  { %1319 = vrcp.f32 %v803_v22 }
 0xece   :  { %v1320_v9 = vpop.eup %1319 }
 0xecf   :  { %v817_v26 = vsub.f32 1.0, %v1320_v9  ;;  %v823_v28 = vmul.f32 %v1320_v9, %v720_v12 }
 0xf25   :  { %v808_v23 = vpop.permute.xlu1 %807 }
 0xf26   :  { %v810_v1 = vmul.f32 %v1320_v9, %v808_v23 }
 0xf28   :  { %812 = vrot.lane.b32.xlu0 %v810_v1, %s1428_s13 }
 0xf9a   :  { %v813_v0 = vpop.permute.xlu0 %812 }
 0xf9b   :  { %v815_v17 = vadd.f32 %v813_v0, %v726_v18 }
 0xf9d   :  { %1321 = vtanh.f32 %v815_v17 }
 0xfa7   :  { %v1322_v25 = vpop.eup %1321 }
 0xfa8   :  { %819 = vrot.lane.b32.xlu1 %v1322_v25, %s1429_s5 }
0x101a   :  { %v820_v27 = vpop.permute.xlu1 %819 }
0x101b   :  { %v822_v29 = vmul.f32 %v820_v27, %v817_v26 }
0x101d   :  { %v824_v30 = vadd.f32 %v823_v28, %v822_v29 }
0x101f   :  { %826 = vrot.lane.b32.xlu0 %v824_v30, %s1429_s5 }
0x1091   :  { %v827_v31 = vpop.permute.xlu0 %826 }
0x1092   :  { %829 = vst.msk [vmem:[%s1701_s7 + $0x5] sm:$0x1] %vm74_vm1, %v827_v31  ;;  %1208 = vmatmul.mubr.msk.f32.vlgmr.msra.gmra.mrb[6].mxu1 %vm116_vm2, %v827_v31 }
0x1165   :  { %v899_v32 = vpop.f32.mrb[6].mxu1 }
0x1166   :  { %v900_v33 = vadd.f32 %v899_v32, %v1582_v24  ;;  %v1209_v34 = vpop.f32.mrb[7].mxu1 }
0x1168   :  { %911 = vrot.lane.b32.xlu1 %v900_v33, %s1428_s13  ;;  %v903_v36 = vadd.f32 %v900_v33, %v830_v35 }
0x116a   :  { %v1074_v37 = vmul.f32 -1.442695, %v903_v36 }
0x116c   :  { %1323 = vpow2.f32 %v1074_v37 }
0x1176   :  { %v1324_v38 = vpop.eup %1323 }
0x1177   :  { %v907_v39 = vadd.f32 1.0, %v1324_v38 }
0x1179   :  { %1325 = vrcp.f32 %v907_v39 }
0x1183   :  { %v1326_v40 = vpop.eup %1325 }
0x1184   :  { %v921_v46 = vsub.f32 1.0, %v1326_v40  ;;  %v927_v48 = vmul.f32 %v1326_v40, %v824_v30 }
0x11da   :  { %v912_v41 = vpop.permute.xlu1 %911 }
0x11db   :  { %v914_v42 = vmul.f32 %v1326_v40, %v912_v41 }
0x11dd   :  { %916 = vrot.lane.b32.xlu0 %v914_v42, %s1428_s13 }
0x124f   :  { %v917_v43 = vpop.permute.xlu0 %916 }
0x1250   :  { %v919_v44 = vadd.f32 %v917_v43, %v830_v35 }
0x1252   :  { %1327 = vtanh.f32 %v919_v44 }
0x125c   :  { %v1328_v45 = vpop.eup %1327 }
0x125d   :  { %923 = vrot.lane.b32.xlu1 %v1328_v45, %s1429_s5 }
0x12cf   :  { %v924_v47 = vpop.permute.xlu1 %923 }
0x12d0   :  { %v926_v49 = vmul.f32 %v924_v47, %v921_v46 }
0x12d2   :  { %v928_v50 = vadd.f32 %v927_v48, %v926_v49 }
0x12d4   :  { %930 = vrot.lane.b32.xlu0 %v928_v50, %s1429_s5 }
0x1346   :  { %v931_v51 = vpop.permute.xlu0 %930 }
0x1347   :  { %933 = vst.msk [vmem:[%s1701_s7 + $0x6] sm:$0x1] %vm74_vm1, %v931_v51  ;;  %1219 = vmatmul.mubr.msk.f32.vlgmr.msra.gmra.mrb[8].mxu0 %vm116_vm2, %v931_v51 }
0x141a   :  { %v1003_v52 = vpop.f32.mrb[8].mxu0 }
0x141b   :  { %v1004_v53 = vadd.f32 %v1003_v52, %v1582_v24  ;;  %v1220_v54 = vpop.f32.mrb[9].mxu0 }
0x141d   :  { %1015 = vrot.lane.b32.xlu1 %v1004_v53, %s1428_s13  ;;  %v1007_v56 = vadd.f32 %v1004_v53, %v934_v55 }
0x141f   :  { %v1076_v57 = vmul.f32 -1.442695, %v1007_v56 }
0x1421   :  { %1329 = vpow2.f32 %v1076_v57 }
0x142b   :  { %v1330_v58 = vpop.eup %1329 }
0x142c   :  { %v1011_v59 = vadd.f32 1.0, %v1330_v58 }
0x142e   :  { %1331 = vrcp.f32 %v1011_v59 }
0x1438   :  { %v1332_v60 = vpop.eup %1331 }
0x1439   :  { %v1025_v24 = vsub.f32 1.0, %v1332_v60  ;;  %v1031_v5 = vmul.f32 %v1332_v60, %v928_v50 }
0x148f   :  { %v1016_v61 = vpop.permute.xlu1 %1015 }
0x1490   :  { %v1018_v62 = vmul.f32 %v1332_v60, %v1016_v61 }
0x1492   :  { %1020 = vrot.lane.b32.xlu0 %v1018_v62, %s1428_s13 }
0x1504   :  { %v1021_v63 = vpop.permute.xlu0 %1020 }
0x1505   :  { %v1023_v2 = vadd.f32 %v1021_v63, %v934_v55 }
0x1507   :  { %1333 = vtanh.f32 %v1023_v2 }
0x1511   :  { %v1334_v3 = vpop.eup %1333 }
0x1512   :  { %1027 = vrot.lane.b32.xlu1 %v1334_v3, %s1429_s5 }
0x1584   :  { %v1028_v4 = vpop.permute.xlu1 %1027 }
0x1585   :  { %v1030_v6 = vmul.f32 %v1028_v4, %v1025_v24 }
0x1587   :  { %v1032_v7 = vadd.f32 %v1031_v5, %v1030_v6 }
0x1589   :  { %1034 = vrot.lane.b32.xlu0 %v1032_v7, %s1429_s5 }
0x15fb   :  { %v1035_v8 = vpop.permute.xlu0 %1034 }
0x15fc   :  { %1037 = vst.msk [vmem:[%s1701_s7 + $0x7] sm:$0x1] %vm74_vm1, %v1035_v8 }
0x15fd   :  { %1042 = vsyncpa [#allocation7], 1 }
0x15fe   :  { %1043 = vsyncpa [#allocation9], 1 }

</bundles_post_ra>
